<compile_context>
chip_gen: v6e
topology: v6e:2x2x1
jax: 0.10.0
libtpu: 0.0.40
codegen_flags: <defaults>
</compile_context>

<pallas_src>
from functools import partial

import jax
import jax.numpy as jnp
from jax.experimental import pallas as pl
from jax.experimental.pallas import tpu as pltpu

_LANES = 512           # lane-axis width per block: multiple of 128 and even
_MAX_BLOCK_ROWS = 512  # (512, 512) f32 = 1 MiB per input per pipeline buffer


def _asym_focal_loss_kernel(yp_ref, yt_ref, out_ref, acc_ref, *,
                            delta, gamma, eps, inv_n):
    # yp_ref / yt_ref: (block_rows, _LANES) f32 tiles of the interleaved data.
    # Flat element index = pixel*2 + channel; since _LANES is even, channel ==
    # lane parity (even lane -> background, odd lane -> foreground).
    @pl.when(pl.program_id(0) == 0)
    def _():
        acc_ref[...] = jnp.zeros_like(acc_ref)

    p = jnp.clip(yp_ref[...], eps, 1.0 - eps)
    ce = -yt_ref[...] * jnp.log(p)

    q = 1.0 - p
    if gamma == 2.0:                       # static Python branch (gamma is baked in)
        focal = q * q                      # avoid pow -> exp(gamma*log(q)) on the EUP
    elif float(gamma).is_integer() and gamma >= 0.0:
        focal = q ** int(gamma)
    else:
        focal = q ** gamma

    lane = jax.lax.broadcasted_iota(jnp.int32, p.shape, dimension=1)
    is_back = (lane & 1) == 0
    # Asymmetric focal loss: focal modulation + (1 - delta) weight on the
    # background channel only; plain delta * CE on the foreground channel.
    weight = jnp.where(is_back, (1.0 - delta) * focal, delta)
    acc_ref[...] += weight * ce

    @pl.when(pl.program_id(0) == pl.num_programs(0) - 1)
    def _():
        out_ref[0, 0] = jnp.sum(acc_ref[...]) * inv_n


def asymmetric_focal_loss(y_pred, y_true, delta=0.25, gamma=2.0, epsilon=1e-7):
    """JAX/Pallas equivalent of AsymmetricFocalLoss.forward.

    y_pred, y_true: (B, H, W, 2) float32 (channel-last probabilities / one-hot).
    Returns a float32 scalar loss.
    """
    assert y_pred.shape == y_true.shape
    assert y_pred.shape[-1] == 2, "AsymmetricFocalLoss expects 2 classes on the last axis"
    n_pixels = 1
    for d in y_pred.shape[:-1]:
        n_pixels *= d
    total = 2 * n_pixels

    # Contiguous flatten (free): channels stay interleaved along the flat axis.
    yp = y_pred.reshape(-1).astype(jnp.float32)
    yt = y_true.reshape(-1).astype(jnp.float32)

    # Tile geometry: (block_rows, _LANES) blocks, block_rows multiple of 8.
    rows_needed = -(-total // _LANES)
    block_rows = min(_MAX_BLOCK_ROWS, ((rows_needed + 7) // 8) * 8)
    num_blocks = -(-rows_needed // block_rows)
    rows_padded = num_blocks * block_rows
    padded_total = rows_padded * _LANES
    if padded_total != total:
        pad = padded_total - total
        yp = jnp.pad(yp, (0, pad))   # padded y_true == 0 -> contributes 0
        yt = jnp.pad(yt, (0, pad))

    yp = yp.reshape(rows_padded, _LANES)
    yt = yt.reshape(rows_padded, _LANES)

    kernel = partial(
        _asym_focal_loss_kernel,
        delta=float(delta),
        gamma=float(gamma),
        eps=float(epsilon),
        inv_n=1.0 / float(n_pixels),
    )

    out = pl.pallas_call(
        kernel,
        out_shape=jax.ShapeDtypeStruct((1, 1), jnp.float32),
        grid_spec=pltpu.PrefetchScalarGridSpec(
            num_scalar_prefetch=0,
            grid=(num_blocks,),
            in_specs=[
                pl.BlockSpec((block_rows, _LANES), lambda i: (i, 0)),
                pl.BlockSpec((block_rows, _LANES), lambda i: (i, 0)),
            ],
            out_specs=pl.BlockSpec(memory_space=pltpu.SMEM),
            scratch_shapes=[pltpu.VMEM((block_rows, _LANES), jnp.float32)],
        ),
        compiler_params=pltpu.CompilerParams(
            dimension_semantics=("arbitrary",)),
    )(yp, yt)
    return out[0, 0]


def _reference_loss(y_pred, y_true, delta=0.25, gamma=2.0, epsilon=1e-7):
    # Pure-JAX reference matching the PyTorch forward exactly.
    p = jnp.clip(y_pred, epsilon, 1.0 - epsilon)
    ce = -y_true * jnp.log(p)
    back_ce = (1.0 - delta) * ((1.0 - p[:, :, :, 0]) ** gamma) * ce[:, :, :, 0]
    fore_ce = delta * ce[:, :, :, 1]
    return jnp.mean(back_ce + fore_ce)


if __name__ == "__main__":
    key = jax.random.PRNGKey(0)
    k_logits, k_labels = jax.random.split(key)

    B, H, W, C = 2, 16, 16, 2
    logits = jax.random.normal(k_logits, (B, H, W, C), dtype=jnp.float32)
    y_pred = jax.nn.softmax(logits, axis=-1)
    labels = jax.random.bernoulli(k_labels, 0.5, (B, H, W)).astype(jnp.int32)
    y_true = jax.nn.one_hot(labels, C, dtype=jnp.float32)

    loss = asymmetric_focal_loss(y_pred, y_true)
    loss = jax.block_until_ready(loss)

    ref = _reference_loss(y_pred, y_true)
    assert jnp.allclose(loss, ref, rtol=1e-5, atol=1e-6), (loss, ref)

    print("KERNEL_OK")
</pallas_src>

<mosaic_0001>
module attributes {stable_mosaic.version = 11 : i64} {
  func.func @_asym_focal_loss_kernel(%arg0: i32, %arg1: memref<8x512xf32, #tpu.memory_space<vmem>>, %arg2: memref<8x512xf32, #tpu.memory_space<vmem>>, %arg3: memref<1x1xf32, #tpu.memory_space<smem>>, %arg4: memref<8x512xf32, #tpu.memory_space<vmem>>) attributes {dimension_semantics = [#tpu.dimension_semantics<arbitrary>], iteration_bounds = array<i64: 1>, scalar_prefetch = 0 : i64, scratch_operands = 1 : i64, tpu.core_type = #tpu.core_type<tc>, window_params = [{transform_indices = @transform_0, window_bounds = array<i64: 8, 512>}, {transform_indices = @transform_1, window_bounds = array<i64: 8, 512>}, {transform_indices = @transform_2, window_bounds = array<i64: 1, 1>}]} {
    %c0_i32 = arith.constant 0 : i32
    %0 = arith.cmpi eq, %arg0, %c0_i32 : i32
    %1 = arith.extui %0 : i1 to i32
    %c0_i32_0 = arith.constant 0 : i32
    %2 = arith.cmpi ne, %1, %c0_i32_0 : i32
    scf.if %2 {
      %cst_16 = arith.constant 0.000000e+00 : f32
      %32 = vector.broadcast %cst_16 : f32 to vector<8x512xf32>
      %c0_17 = arith.constant 0 : index
      %c0_18 = arith.constant 0 : index
      %33 = vector.load %arg4[%c0_17, %c0_18] : memref<8x512xf32, #tpu.memory_space<vmem>>, vector<8x512xf32>
      tpu.vector_store %arg4[%c0_17, %c0_18], %32 {strides = array<i32>} : memref<8x512xf32, #tpu.memory_space<vmem>>, vector<8x512xf32>,
    } else {
    }
    %c0 = arith.constant 0 : index
    %c0_1 = arith.constant 0 : index
    %3 = vector.load %arg1[%c0, %c0_1] : memref<8x512xf32, #tpu.memory_space<vmem>>, vector<8x512xf32>
    %cst = arith.constant 1.000000e-07 : f32
    %cst_2 = arith.constant 0.99999988 : f32
    %4 = vector.broadcast %cst : f32 to vector<8x512xf32>
    %5 = arith.maximumf %4, %3 : vector<8x512xf32>
    %6 = vector.broadcast %cst_2 : f32 to vector<8x512xf32>
    %7 = arith.minimumf %6, %5 : vector<8x512xf32>
    %c0_3 = arith.constant 0 : index
    %c0_4 = arith.constant 0 : index
    %8 = vector.load %arg2[%c0_3, %c0_4] : memref<8x512xf32, #tpu.memory_space<vmem>>, vector<8x512xf32>
    %cst_5 = arith.constant 0.000000e+00 : f32
    %9 = vector.broadcast %cst_5 : f32 to vector<8x512xf32>
    %10 = arith.subf %9, %8 : vector<8x512xf32>
    %11 = math.log %7 : vector<8x512xf32>
    %12 = arith.mulf %10, %11 : vector<8x512xf32>
    %cst_6 = arith.constant 1.000000e+00 : f32
    %13 = vector.broadcast %cst_6 : f32 to vector<8x512xf32>
    %14 = arith.subf %13, %7 : vector<8x512xf32>
    %15 = arith.mulf %14, %14 : vector<8x512xf32>
    %16 = tpu.iota {dimensions = array<i32: 1>} : vector<8x512xi32>
    %c1_i32 = arith.constant 1 : i32
    %17 = vector.broadcast %c1_i32 : i32 to vector<8x512xi32>
    %18 = arith.andi %16, %17 : vector<8x512xi32>
    %c0_i32_7 = arith.constant 0 : i32
    %19 = vector.broadcast %c0_i32_7 : i32 to vector<8x512xi32>
    %20 = arith.cmpi eq, %18, %19 : vector<8x512xi32>
    %cst_8 = arith.constant 7.500000e-01 : f32
    %21 = vector.broadcast %cst_8 : f32 to vector<8x512xf32>
    %22 = arith.mulf %21, %15 : vector<8x512xf32>
    %cst_9 = arith.constant 2.500000e-01 : f32
    %23 = vector.broadcast %cst_9 : f32 to vector<8x512xf32>
    %24 = arith.select %20, %22, %23 : vector<8x512xi1>, vector<8x512xf32>
    %c0_10 = arith.constant 0 : index
    %c0_11 = arith.constant 0 : index
    %25 = vector.load %arg4[%c0_10, %c0_11] : memref<8x512xf32, #tpu.memory_space<vmem>>, vector<8x512xf32>
    %26 = arith.mulf %24, %12 : vector<8x512xf32>
    %27 = arith.addf %25, %26 : vector<8x512xf32>
    %c0_12 = arith.constant 0 : index
    %c0_13 = arith.constant 0 : index
    %28 = vector.load %arg4[%c0_12, %c0_13] : memref<8x512xf32, #tpu.memory_space<vmem>>, vector<8x512xf32>
    tpu.vector_store %arg4[%c0_12, %c0_13], %27 {strides = array<i32>} : memref<8x512xf32, #tpu.memory_space<vmem>>, vector<8x512xf32>,
    %c0_i32_14 = arith.constant 0 : i32
    %29 = arith.cmpi eq, %arg0, %c0_i32_14 : i32
    %30 = arith.extui %29 : i1 to i32
    %c0_i32_15 = arith.constant 0 : i32
    %31 = arith.cmpi ne, %30, %c0_i32_15 : i32
    scf.if %31 {
      %c0_16 = arith.constant 0 : index
      %c0_17 = arith.constant 0 : index
      %32 = vector.load %arg4[%c0_16, %c0_17] : memref<8x512xf32, #tpu.memory_space<vmem>>, vector<8x512xf32>
      %33 = vector.shape_cast %32 : vector<8x512xf32> to vector<1x8x512xf32>
      %cst_18 = arith.constant dense<0.000000e+00> : vector<1xf32>
      %34 = vector.multi_reduction <add>, %33, %cst_18 [1, 2] : vector<1x8x512xf32> to vector<1xf32>
      %35 = vector.shape_cast %34 : vector<1xf32> to vector<1x1x1xf32>
      %36 = vector.extract %35[0, 0, 0] : f32 from vector<1x1x1xf32>
      %cst_19 = arith.constant 0.001953125 : f32
      %37 = arith.mulf %36, %cst_19 : f32
      %c0_20 = arith.constant 0 : index
      %c0_21 = arith.constant 0 : index
      %38 = memref.load %arg3[%c0_20, %c0_21] : memref<1x1xf32, #tpu.memory_space<smem>>
      memref.store %37, %arg3[%c0_20, %c0_21] : memref<1x1xf32, #tpu.memory_space<smem>>
    } else {
    }
    return
  }
  func.func @transform_0(%arg0: i32) -> (i32, i32) {
    %c0_i32 = arith.constant 0 : i32
    %c0_i32_0 = arith.constant 0 : i32
    return %arg0, %c0_i32 : i32, i32
  }
  func.func @transform_1(%arg0: i32) -> (i32, i32) {
    %c0_i32 = arith.constant 0 : i32
    %c0_i32_0 = arith.constant 0 : i32
    return %arg0, %c0_i32 : i32, i32
  }
  func.func @transform_2(%arg0: i32) -> (i32, i32) {
    %c0_i32 = arith.constant 0 : i32
    %c0_i32_0 = arith.constant 0 : i32
    %c0_i32_1 = arith.constant 0 : i32
    return %c0_i32, %c0_i32_0 : i32, i32
  }
}

</mosaic_0001>

<bundles_post_ra>
// kernel: tpu_custom_call.1
= control target key start
LH: loop header
LB: loop body
LE: loop exit
PB: predicated region body
PF: predicated region fallthrough
CT: control target
= control target key end

     0   :  { %7 = vsyncpa [#allocation4], 0  ;;  %s270_s0 = inlined_call_operand.hbm [shape: f32[8,512], index: 0, kind: input, shape index: {}]   ;;  %s271_s1 = inlined_call_operand.hbm [shape: f32[8,512], index: 1, kind: input, shape index: {}]   ;;  %s272_s2 = inlined_call_operand.hbm [shape: f32[1,1], index: 2, kind: output, shape index: {}]  }
   0x1   :  { %8 = vsyncpa [#allocation7], 0 }
   0x2   :  { %9 = vsyncpa [#allocation5], 0  ;;  %s225_s9 = smov [#allocation3]   ;;  %s226_s11 = smov [#allocation6]  }
   0x3   :  { %s16_s10 = sshll.u32 %s225_s9, 4  ;;  %s26_s12 = sshll.u32 %s226_s11, 4  ;;  %s17_s10 = int_to_ptr.vmem [resolvable:$true] %s16_s10  ;;  %s27_s12 = int_to_ptr.vmem [resolvable:$true] %s26_s12 }
   0x4   :  { %s179_s13 = scalar_lea.vmem %s17_s10, 512  ;;  %p184_p1 = scmp.lt.s32.totalorder %s17_s10, %s17_s10 }
   0x5   :  { %p180_p0 = scmp.ne.s32.totalorder %s17_s10, %s179_s13  ;;  %p185_p2 = scmp.lt.s32.totalorder %s179_s13, %s179_s13 }
   0x7   :  { %p186_p3 = por %p185_p2, %p184_p1 }
   0x9   :  { %p187_p4 = pnand %p186_p3, %p180_p0 }
   0xb   :  { %190 = shalt.err (!%p187_p4)
}
   0xc   :  { %19 = dma.hbm_to_vmem [thread:$0]  %s270_s0, 512, %s17_s10, [#allocation4]  }
   0xd   :  { %s199_s16 = scalar_lea.vmem %s27_s12, 512  ;;  %p204_p6 = scmp.lt.s32.totalorder %s27_s12, %s27_s12 }
   0xe   :  { %p200_p5 = scmp.ne.s32.totalorder %s27_s12, %s199_s16  ;;  %p205_p7 = scmp.lt.s32.totalorder %s199_s16, %s199_s16 }
  0x10   :  { %p206_p8 = por %p205_p7, %p204_p6 }
  0x12   :  { %p207_p9 = pnand %p206_p8, %p200_p5 }
  0x14   :  { %210 = shalt.err (!%p207_p9)
}
  0x15   :  { %29 = dma.hbm_to_vmem [thread:$0]  %s271_s1, 512, %s27_s12, [#allocation7]  }
  0x16   :  { %219 = dma.done.wait [#allocation4], 512  }
  0x17   :  { %220 = vsyncadd [#allocation4], 4294966784 }
  0x18   :  { %221 = dma.done.wait [#allocation7], 512  }
  0x19   :  { %222 = vsyncadd [#allocation7], 4294966784  ;;  %v44_v0 = vld [vmem:[#allocation3] sm:$0xff]  ;;  %v45_v1 = vld [vmem:[#allocation3 + $0x8] sm:$0xff]  ;;  %v84_v8 = vlaneseq  ;;  %s227_s19 = smov [#allocation8]  }
  0x1a   :  { %v46_v2 = vld [vmem:[#allocation3 + $0x10] sm:$0xff]  ;;  %v47_v3 = vld [vmem:[#allocation3 + $0x18] sm:$0xff]  ;;  %v48_v4 = vmax.f32 %v44_v0, 1e-07  ;;  %v49_v5 = vmax.f32 %v45_v1, 1e-07 }
  0x1b   :  { %v50_v6 = vmax.f32 %v46_v2, 1e-07  ;;  %v51_v7 = vmax.f32 %v47_v3, 1e-07  ;;  %v85_v13 = vand.u32 127, %v84_v8  ;;  %v56_v24 = vld [vmem:[#allocation6] sm:$0xff] }
  0x1c   :  { %v52_v9 = vmin.f32 %v48_v4, 0.9999999  ;;  %v53_v10 = vmin.f32 %v49_v5, 0.9999999  ;;  %v57_v27 = vld [vmem:[#allocation6 + $0x8] sm:$0xff]  ;;  %v58_v30 = vld [vmem:[#allocation6 + $0x10] sm:$0xff] }
  0x1d   :  { %v54_v11 = vmin.f32 %v50_v6, 0.9999999  ;;  %v55_v12 = vmin.f32 %v51_v7, 0.9999999  ;;  %v86_v17 = vadd.s32 128, %v85_v13  ;;  %v87_v19 = vadd.s32 256, %v85_v13 }
  0x1e   :  { %163 = vlog2.f32 %v52_v9  ;;  %v76_v14 = vsub.f32 1.0, %v52_v9  ;;  %v77_v15 = vsub.f32 1.0, %v53_v10  ;;  %v88_v21 = vadd.s32 384, %v85_v13  ;;  %v59_v33 = vld [vmem:[#allocation6 + $0x18] sm:$0xff] }
  0x1f   :  { %165 = vlog2.f32 %v53_v10  ;;  %v78_v16 = vsub.f32 1.0, %v54_v11  ;;  %v79_v18 = vsub.f32 1.0, %v55_v12  ;;  %v89_v23 = vand.u32 1, %v85_v13 }
  0x20   :  { %167 = vlog2.f32 %v54_v11  ;;  %v80_v20 = vmul.f32 %v76_v14, %v76_v14  ;;  %v81_v22 = vmul.f32 %v77_v15, %v77_v15  ;;  %v90_v26 = vand.u32 1, %v86_v17 }
  0x21   :  { %169 = vlog2.f32 %v55_v12  ;;  %v82_v25 = vmul.f32 %v78_v16, %v78_v16  ;;  %v83_v28 = vmul.f32 %v79_v18, %v79_v18  ;;  %v91_v29 = vand.u32 1, %v87_v19 }
  0x22   :  { %v92_v31 = vand.u32 1, %v88_v21  ;;  %v97_v32 = vmul.f32 0.75, %v80_v20  ;;  %v60_v34 = vsub.f32 0.0, %v56_v24  ;;  %vm249_vm0 = vcmp.eq.s32.totalorder %v89_v23, 0 }
  0x23   :  { %v98_v36 = vmul.f32 0.75, %v81_v22  ;;  %v61_v38 = vsub.f32 0.0, %v57_v27  ;;  %vm253_vm1 = vcmp.eq.s32.totalorder %v90_v26, 0  ;;  %v99_v40 = vmul.f32 0.75, %v82_v25 }
  0x24   :  { %v62_v42 = vsub.f32 0.0, %v58_v30  ;;  %vm257_vm2 = vcmp.eq.s32.totalorder %v91_v29, 0  ;;  %v100_v45 = vmul.f32 0.75, %v83_v28  ;;  %v63_v47 = vsub.f32 0.0, %v59_v33 }
  0x25   :  { %vm96_vm3 = vcmp.eq.s32.totalorder %v92_v31, 0  ;;  %v101_v49 = vsel %vm249_vm0, %v97_v32, 0.25  ;;  %v102_v53 = vsel %vm253_vm1, %v98_v36, 0.25  ;;  %v103_v56 = vsel %vm257_vm2, %v99_v40, 0.25 }
  0x26   :  { %v104_v58 = vsel %vm96_vm3, %v100_v45, 0.25 }
  0x2b   :  { %v164_v37 = vpop.eup %163 }
  0x2c   :  { %v166_v41 = vpop.eup %165  ;;  %v65_v43 = vmul.f32 0.6931472, %v164_v37 }
  0x2d   :  { %v168_v46 = vpop.eup %167  ;;  %v67_v48 = vmul.f32 0.6931472, %v166_v41 }
  0x2e   :  { %v170_v50 = vpop.eup %169  ;;  %v69_v51 = vmul.f32 0.6931472, %v168_v46  ;;  %v72_v52 = vmul.f32 %v65_v43, %v60_v34 }
  0x2f   :  { %v71_v54 = vmul.f32 0.6931472, %v170_v50  ;;  %v73_v55 = vmul.f32 %v67_v48, %v61_v38 }
  0x30   :  { %v74_v57 = vmul.f32 %v69_v51, %v62_v42  ;;  %v109_v59 = vmul.f32 %v101_v49, %v72_v52 }
  0x31   :  { %v75_v60 = vmul.f32 %v71_v54, %v63_v47  ;;  %v110_v61 = vmul.f32 %v102_v53, %v73_v55 }
  0x32   :  { %v111_v62 = vmul.f32 %v103_v56, %v74_v57 }
  0x33   :  { %v112_v63 = vmul.f32 %v104_v58, %v75_v60  ;;  %v128_v0 = vadd.f32 %v110_v61, %v109_v59 }
  0x35   :  { %v129_v1 = vadd.f32 %v128_v0, %v111_v62 }
  0x37   :  { %v130_v2 = vadd.f32 %v129_v1, %v112_v63 }
  0x39   :  { %131 = vadd.xlane.f32.xlu0 %v130_v2 }
  0xc2   :  { %v132_v3 = vpop.xlane.xlu0 %131 }
  0xc3   :  { %v133_v4 = vrot.slane %v132_v3, 4 }
  0xc5   :  { %v134_v5 = vadd.f32 %v133_v4, %v132_v3 }
  0xc7   :  { %v135_v6 = vrot.slane %v134_v5, 2 }
  0xc9   :  { %v136_v7 = vadd.f32 %v135_v6, %v134_v5 }
  0xcb   :  { %v137_v8 = vrot.slane %v136_v7, 1 }
  0xcd   :  { %v138_v9 = vadd.f32 %v137_v8, %v136_v7 }
  0xcf   :  { %158 = vpush %v138_v9 }
 0x100   :  { %s159_s0 = spop %158 }
 0x101   :  { %s140_s1 = smul.f32 0.001953125, %s159_s0 }
 0x103   :  { %142 = sst [smem:[#allocation8]] %s140_s1 }
 0x104   :  { %150 = dma.smem_to_hbm %s227_s19, 16, %s272_s2, [#allocation5]  }
 0x105   :  { %223 = dma.done.wait [#allocation5], 16  }
 0x106   :  { %224 = vsyncadd [#allocation5], 4294967280 }
 0x107   :  { %154 = sfence }
 0x108   :  { %155 = vsyncpa [#allocation4], 1 }
 0x109   :  { %156 = vsyncpa [#allocation7], 1 }
 0x10a   :  { %157 = vsyncpa [#allocation5], 1 }

</bundles_post_ra>
